<compile_context>
chip_gen: v6e
topology: v6e:2x2x1
jax: 0.10.0
libtpu: 0.0.40
codegen_flags: <defaults>
</compile_context>

<pallas_src>
import functools

import jax
import jax.numpy as jnp
from jax import lax
from jax.experimental import pallas as pl
from jax.experimental.pallas import tpu as pltpu


def _round_up(x: int, m: int) -> int:
    return (x + m - 1) // m * m


def _edge_score_kernel(src_ref, dst_ref,   # (1, tile_e) int32 ids, streamed per tile
                       put_ref, pvt_ref,   # (C8, NU) / (C8, NI) f32 projection tables (resident)
                       o_ref):             # (C8, tile_e) f32 output block
    nu = put_ref.shape[1]
    ni = pvt_ref.shape[1]
    te = o_ref.shape[1]

    src = src_ref[...]                     # (1, te) int32
    dst = dst_ref[...]                     # (1, te) int32

    one = jnp.float32(1.0)
    zero = jnp.float32(0.0)

    # Vectorized one-hot gather on the MXU (replaces the old serial per-row
    # scalar loop): onehot[n, e] = (n == id[e]).
    oh_u = jnp.where(lax.broadcasted_iota(jnp.int32, (nu, te), 0) == src, one, zero)
    oh_v = jnp.where(lax.broadcasted_iota(jnp.int32, (ni, te), 0) == dst, one, zero)

    # (C8, N) @ (N, te) -> (C8, te): selects Pu^T[:, src[e]] / Pv^T[:, dst[e]].
    acc = jnp.dot(put_ref[...], oh_u, preferred_element_type=jnp.float32)
    acc = acc + jnp.dot(pvt_ref[...], oh_v, preferred_element_type=jnp.float32)

    o_ref[...] = acc.astype(o_ref.dtype)


@functools.partial(jax.jit, static_argnames=("tile_e",))
def mlp_predictor_forward(src_ids, dst_ids, user_feats, item_feats, W, b,
                          tile_e: int = 512):
    """Equivalent of MLPPredictor.forward over an explicit edge list.

    Args:
      src_ids:    (E,) int32   source (user) node id per edge
      dst_ids:    (E,) int32   destination (item) node id per edge
      user_feats: (Nu, F0) f32 'user_features'
      item_feats: (Ni, F1) f32 'item_features'
      W:          (C, F0+F1) f32  (PyTorch nn.Linear weight layout)
      b:          (C,) f32
    Returns:
      scores: (E, C) f32
    """
    E = src_ids.shape[0]
    Nu, F0 = user_feats.shape
    Ni, F1 = item_feats.shape
    C = W.shape[0]

    # ---- algorithmic hoist: per-node projections (wrapper-side XLA matmuls) --
    #   concat(u, v) @ W.T + b == (u @ W[:, :F0].T + b) + (v @ W[:, F0:].T)
    # The bias is folded into the user table; the one-hot row sums to exactly
    # 1 per edge, so it is applied exactly once.
    hi = lax.Precision.HIGHEST
    put = jnp.dot(W[:, :F0], user_feats.T.astype(W.dtype), precision=hi) + b[:, None]
    pvt = jnp.dot(W[:, F0:], item_feats.T.astype(W.dtype), precision=hi)
    put = put.astype(jnp.float32)                       # (C, Nu)
    pvt = pvt.astype(jnp.float32)                       # (C, Ni)

    # Pad class rows to a sublane multiple (unmasked stores, zero extra HBM
    # cost vs. the (8,128)-tiled physical layout) and node columns to the MXU
    # K tile.  Padded rows/columns are zeros and never selected.
    C8 = _round_up(C, 8)
    NU = _round_up(Nu, 128)
    NI = _round_up(Ni, 128)
    put = jnp.pad(put, ((0, C8 - C), (0, NU - Nu)))
    pvt = jnp.pad(pvt, ((0, C8 - C), (0, NI - Ni)))

    # ---- edge tiling: multiple of 128 (lane-dense), aim for >= 4 grid steps --
    tile_e = max(128, _round_up(int(tile_e), 128))
    while tile_e > 128 and (E + tile_e - 1) // tile_e < 4:
        tile_e = max(128, ((tile_e // 2) // 128) * 128)
    E_pad = _round_up(max(E, 1), tile_e)
    grid = (E_pad // tile_e,)

    # Only the cheap id vectors are padded (padded edges gather node 0 and are
    # sliced off); they stream per tile as (1, tile_e) VMEM blocks — no full
    # edge-list SMEM prefetch.
    src2 = jnp.pad(src_ids.astype(jnp.int32), (0, E_pad - E)).reshape(1, E_pad)
    dst2 = jnp.pad(dst_ids.astype(jnp.int32), (0, E_pad - E)).reshape(1, E_pad)

    # ---- generation-aware VMEM budget ---------------------------------------
    est = (
        2 * C8 * (NU + NI) * 4              # resident projection tables (x2: pipeline bufs)
        + 2 * 2 * 8 * tile_e * 4            # two id blocks, double-buffered, 8-sublane pad
        + 2 * C8 * tile_e * 4               # output block, double-buffered
        + (NU + NI + C8) * tile_e * 4       # one-hot + accumulator temporaries
        + 2 * 1024 * 1024                   # headroom
    )
    try:
        vmem_cap = int(pltpu.get_tpu_info().vmem_capacity_bytes)
    except Exception:
        vmem_cap = 64 * 1024 * 1024         # conservative (v7x per-TC) fallback
    vmem_limit = int(min(max(est, 16 * 1024 * 1024), (vmem_cap * 3) // 4))

    out = pl.pallas_call(
        _edge_score_kernel,
        out_shape=jax.ShapeDtypeStruct((C8, E_pad), jnp.float32),
        grid_spec=pltpu.PrefetchScalarGridSpec(
            num_scalar_prefetch=0,
            grid=grid,
            in_specs=[
                pl.BlockSpec((1, tile_e), lambda i: (0, i)),   # src ids (streamed)
                pl.BlockSpec((1, tile_e), lambda i: (0, i)),   # dst ids (streamed)
                pl.BlockSpec((C8, NU), lambda i: (0, 0)),      # Pu^T (+bias), resident
                pl.BlockSpec((C8, NI), lambda i: (0, 0)),      # Pv^T, resident
            ],
            out_specs=pl.BlockSpec((C8, tile_e), lambda i: (0, i)),
        ),
        compiler_params=pltpu.CompilerParams(
            dimension_semantics=("parallel",),   # edge axis shards across TCs
            vmem_limit_bytes=vmem_limit,
        ),
    )(src2, dst2, put, pvt)

    # (C8, E_pad) -> (E, C); the transpose is a tiny XLA op on useful data only.
    return out[:C, :E].T


if __name__ == "__main__":
    key = jax.random.PRNGKey(0)
    k_u, k_i, k_w, k_b, k_s, k_d = jax.random.split(key, 6)

    # Small shapes consistent with the module:
    #   users: Nu=6, F0=4 (h_feats_0); items: Ni=5, F1=6 (h_feats_1);
    #   out_classes C=2 (GraphSAGE builds MLPPredictor(h0, h1, 2)); edges E=16.
    Nu, Ni, F0, F1, C, E = 6, 5, 4, 6, 2, 16

    user_feats = jax.random.normal(k_u, (Nu, F0), dtype=jnp.float32)
    item_feats = jax.random.normal(k_i, (Ni, F1), dtype=jnp.float32)

    # Deterministic Linear params (W: [C, F0+F1], b: [C]) — synthetic init.
    W = jax.random.normal(k_w, (C, F0 + F1), dtype=jnp.float32) * 0.1
    b = jax.random.normal(k_b, (C,), dtype=jnp.float32) * 0.1

    # Deterministic bipartite edge list (user -> item).
    src_ids = jax.random.randint(k_s, (E,), 0, Nu, dtype=jnp.int32)
    dst_ids = jax.random.randint(k_d, (E,), 0, Ni, dtype=jnp.int32)

    scores = mlp_predictor_forward(src_ids, dst_ids, user_feats, item_feats, W, b)
    scores = jax.block_until_ready(scores)

    # Pure-JAX f32 reference (concat + Linear), same as the PyTorch apply_edges.
    feat_cat = jnp.concatenate([user_feats[src_ids], item_feats[dst_ids]], axis=1)
    ref = jnp.dot(feat_cat, W.T, precision=lax.Precision.HIGHEST) + b

    assert scores.shape == (E, C)
    assert jnp.allclose(scores, ref, atol=5e-3, rtol=5e-3)

    print("KERNEL_OK")
</pallas_src>

<mosaic_0001>
module attributes {stable_mosaic.version = 11 : i64} {
  func.func @_edge_score_kernel(%arg0: i32, %arg1: memref<1x128xi32, #tpu.memory_space<vmem>>, %arg2: memref<1x128xi32, #tpu.memory_space<vmem>>, %arg3: memref<8x128xf32, #tpu.memory_space<vmem>>, %arg4: memref<8x128xf32, #tpu.memory_space<vmem>>, %arg5: memref<8x128xf32, #tpu.memory_space<vmem>>) attributes {dimension_semantics = [#tpu.dimension_semantics<parallel>], iteration_bounds = array<i64: 1>, scalar_prefetch = 0 : i64, scratch_operands = 0 : i64, tpu.core_type = #tpu.core_type<tc>, window_params = [{transform_indices = @transform_0, window_bounds = array<i64: 1, 128>}, {transform_indices = @transform_1, window_bounds = array<i64: 1, 128>}, {pipeline_mode = #tpu.pipeline_mode<synchronous>, transform_indices = @transform_2, window_bounds = array<i64: 8, 128>}, {pipeline_mode = #tpu.pipeline_mode<synchronous>, transform_indices = @transform_3, window_bounds = array<i64: 8, 128>}, {transform_indices = @transform_4, window_bounds = array<i64: 8, 128>}]} {
    %c0 = arith.constant 0 : index
    %c0_0 = arith.constant 0 : index
    %0 = vector.load %arg1[%c0, %c0_0] : memref<1x128xi32, #tpu.memory_space<vmem>>, vector<1x128xi32>
    %c0_1 = arith.constant 0 : index
    %c0_2 = arith.constant 0 : index
    %1 = vector.load %arg2[%c0_1, %c0_2] : memref<1x128xi32, #tpu.memory_space<vmem>>, vector<1x128xi32>
    %2 = tpu.iota {dimensions = array<i32: 0>} : vector<128x128xi32>
    %3 = vector.broadcast %0 : vector<1x128xi32> to vector<128x128xi32>
    %4 = arith.cmpi eq, %2, %3 : vector<128x128xi32>
    %cst = arith.constant 1.000000e+00 : f32
    %cst_3 = arith.constant 0.000000e+00 : f32
    %5 = vector.broadcast %cst : f32 to vector<128x128xf32>
    %6 = vector.broadcast %cst_3 : f32 to vector<128x128xf32>
    %7 = arith.select %4, %5, %6 : vector<128x128xi1>, vector<128x128xf32>
    %8 = tpu.iota {dimensions = array<i32: 0>} : vector<128x128xi32>
    %9 = vector.broadcast %1 : vector<1x128xi32> to vector<128x128xi32>
    %10 = arith.cmpi eq, %8, %9 : vector<128x128xi32>
    %cst_4 = arith.constant 1.000000e+00 : f32
    %cst_5 = arith.constant 0.000000e+00 : f32
    %11 = vector.broadcast %cst_4 : f32 to vector<128x128xf32>
    %12 = vector.broadcast %cst_5 : f32 to vector<128x128xf32>
    %13 = arith.select %10, %11, %12 : vector<128x128xi1>, vector<128x128xf32>
    %c0_6 = arith.constant 0 : index
    %c0_7 = arith.constant 0 : index
    %14 = vector.load %arg3[%c0_6, %c0_7] : memref<8x128xf32, #tpu.memory_space<vmem>>, vector<8x128xf32>
    %cst_8 = arith.constant dense<0.000000e+00> : vector<8x128xf32>
    %15 = tpu.matmul %14, %7, %cst_8 {dimension_numbers = #tpu.dot_dimension_numbers<[1], [0], [0], [1], [0, 0, 1, 1], [], []>} : vector<8x128xf32>, vector<128x128xf32>, vector<8x128xf32> -> vector<8x128xf32>
    %c0_9 = arith.constant 0 : index
    %c0_10 = arith.constant 0 : index
    %16 = vector.load %arg4[%c0_9, %c0_10] : memref<8x128xf32, #tpu.memory_space<vmem>>, vector<8x128xf32>
    %cst_11 = arith.constant dense<0.000000e+00> : vector<8x128xf32>
    %17 = tpu.matmul %16, %13, %cst_11 {dimension_numbers = #tpu.dot_dimension_numbers<[1], [0], [0], [1], [0, 0, 1, 1], [], []>} : vector<8x128xf32>, vector<128x128xf32>, vector<8x128xf32> -> vector<8x128xf32>
    %18 = arith.addf %15, %17 : vector<8x128xf32>
    %c0_12 = arith.constant 0 : index
    %c0_13 = arith.constant 0 : index
    %19 = vector.load %arg5[%c0_12, %c0_13] : memref<8x128xf32, #tpu.memory_space<vmem>>, vector<8x128xf32>
    tpu.vector_store %arg5[%c0_12, %c0_13], %18 {strides = array<i32>} : memref<8x128xf32, #tpu.memory_space<vmem>>, vector<8x128xf32>,
    return
  }
  func.func @transform_0(%arg0: i32) -> (i32, i32) {
    %c0_i32 = arith.constant 0 : i32
    %c0_i32_0 = arith.constant 0 : i32
    return %c0_i32, %arg0 : i32, i32
  }
  func.func @transform_1(%arg0: i32) -> (i32, i32) {
    %c0_i32 = arith.constant 0 : i32
    %c0_i32_0 = arith.constant 0 : i32
    return %c0_i32, %arg0 : i32, i32
  }
  func.func @transform_2(%arg0: i32) -> (i32, i32) {
    %c0_i32 = arith.constant 0 : i32
    %c0_i32_0 = arith.constant 0 : i32
    %c0_i32_1 = arith.constant 0 : i32
    return %c0_i32, %c0_i32_0 : i32, i32
  }
  func.func @transform_3(%arg0: i32) -> (i32, i32) {
    %c0_i32 = arith.constant 0 : i32
    %c0_i32_0 = arith.constant 0 : i32
    %c0_i32_1 = arith.constant 0 : i32
    return %c0_i32, %c0_i32_0 : i32, i32
  }
  func.func @transform_4(%arg0: i32) -> (i32, i32) {
    %c0_i32 = arith.constant 0 : i32
    %c0_i32_0 = arith.constant 0 : i32
    return %c0_i32, %arg0 : i32, i32
  }
}

</mosaic_0001>

<bundles_post_ra>
// kernel: mlp_predictor_forward.1
= control target key start
LH: loop header
LB: loop body
LE: loop exit
PB: predicated region body
PF: predicated region fallthrough
CT: control target
= control target key end

     0   :  { %v19_v0 = vlaneseq  ;;  %v396_v1 = vmov 0.0   ;;  %vm397_vm0 = vmmov 0   ;;  %v398_v9 = vmov 1.0   ;;  %s560_s1 = inlined_call_operand.vmem [shape: s32[1,128], index: 1, kind: input, shape index: {}]   ;;  %s561_s0 = inlined_call_operand.vmem [shape: s32[1,128], index: 0, kind: input, shape index: {}]   ;;  %s562_s3 = inlined_call_operand.vmem [shape: f32[8,128], index: 3, kind: input, shape index: {}]   ;;  %s563_s2 = inlined_call_operand.vmem [shape: f32[8,128], index: 2, kind: input, shape index: {}]   ;;  %s564_s4 = inlined_call_operand.vmem [shape: f32[8,128], index: 4, kind: output, shape index: {}]  }
   0x1   :  { %323 = vmatprep.subr.mxu0 %v396_v1  ;;  %358 = vmatprep.subr.mxu1 %v396_v1  ;;  %v433_v3 = vld [vmem:[%s560_s1] ss:$0 sm:$0xff] }
   0x2   :  { %v426_v2 = vshrl.u32 %v19_v0, 7  ;;  %355 = vmatprep.mubr.msk.f32.mxu0 %vm397_vm0, %v396_v1  ;;  %390 = vmatprep.mubr.msk.f32.mxu1 %vm397_vm0, %v396_v1  ;;  %v438_v4 = vld [vmem:[%s561_s0] ss:$0 sm:$0xff] }
   0x3   :  { %v109_v21 = vld [vmem:[%s562_s3] sm:$0xff] }
   0x4   :  { %v35_v5 = vadd.s32 120, %v426_v2  ;;  %v34_v6 = vadd.s32 112, %v426_v2  ;;  %v33_v7 = vadd.s32 104, %v426_v2  ;;  %v32_v8 = vadd.s32 96, %v426_v2  ;;  %v108_v22 = vld [vmem:[%s563_s2] sm:$0xff] }
   0x5   :  { %v31_v10 = vadd.s32 88, %v426_v2  ;;  %v30_v11 = vadd.s32 80, %v426_v2  ;;  %v29_v12 = vadd.s32 72, %v426_v2  ;;  %v28_v13 = vadd.s32 64, %v426_v2 }
   0x6   :  { %vm91_vm1 = vcmp.eq.s32.totalorder %v35_v5, %v433_v3  ;;  %vm55_vm2 = vcmp.eq.s32.totalorder %v35_v5, %v438_v4  ;;  %vm90_vm3 = vcmp.eq.s32.totalorder %v34_v6, %v433_v3  ;;  %vm54_vm4 = vcmp.eq.s32.totalorder %v34_v6, %v438_v4 }
   0x7   :  { %324 = vmatpush3.msk.msra.mxu0 %vm91_vm1, %v398_v9  ;;  %359 = vmatpush3.msk.msra.mxu1 %vm55_vm2, %v398_v9  ;;  %vm89_vm5 = vcmp.eq.s32.totalorder %v33_v7, %v433_v3  ;;  %vm53_vm6 = vcmp.eq.s32.totalorder %v33_v7, %v438_v4  ;;  %vm88_vm7 = vcmp.eq.s32.totalorder %v32_v8, %v433_v3  ;;  %v27_v14 = vadd.s32 56, %v426_v2 }
   0x8   :  { %325 = vmatprep.subr.mxu0 %v396_v1  ;;  %360 = vmatprep.subr.mxu1 %v396_v1  ;;  %vm52_vm8 = vcmp.eq.s32.totalorder %v32_v8, %v438_v4  ;;  %vm87_vm9 = vcmp.eq.s32.totalorder %v31_v10, %v433_v3  ;;  %vm51_vm10 = vcmp.eq.s32.totalorder %v31_v10, %v438_v4  ;;  %v26_v15 = vadd.s32 48, %v426_v2 }
   0x9   :  { %326 = vmatpush3.msk.msra.mxu0 %vm90_vm3, %v398_v9  ;;  %361 = vmatpush3.msk.msra.mxu1 %vm54_vm4, %v398_v9  ;;  %vm86_vm11 = vcmp.eq.s32.totalorder %v30_v11, %v433_v3  ;;  %vm50_vm12 = vcmp.eq.s32.totalorder %v30_v11, %v438_v4  ;;  %vm85_vm13 = vcmp.eq.s32.totalorder %v29_v12, %v433_v3  ;;  %v25_v16 = vadd.s32 40, %v426_v2 }
   0xa   :  { %327 = vmatprep.subr.mxu0 %v396_v1  ;;  %362 = vmatprep.subr.mxu1 %v396_v1  ;;  %vm49_vm14 = vcmp.eq.s32.totalorder %v29_v12, %v438_v4  ;;  %vm84_vm15 = vcmp.eq.s32.totalorder %v28_v13, %v433_v3  ;;  %vm48_vm0 = vcmp.eq.s32.totalorder %v28_v13, %v438_v4  ;;  %v24_v17 = vadd.s32 32, %v426_v2 }
   0xb   :  { %328 = vmatpush3.msk.msra.mxu0 %vm89_vm5, %v398_v9  ;;  %363 = vmatpush3.msk.msra.mxu1 %vm53_vm6, %v398_v9  ;;  %vm83_vm1 = vcmp.eq.s32.totalorder %v27_v14, %v433_v3  ;;  %vm47_vm2 = vcmp.eq.s32.totalorder %v27_v14, %v438_v4  ;;  %vm82_vm3 = vcmp.eq.s32.totalorder %v26_v15, %v433_v3  ;;  %v23_v18 = vadd.s32 24, %v426_v2 }
   0xc   :  { %329 = vmatprep.subr.mxu0 %v396_v1  ;;  %364 = vmatprep.subr.mxu1 %v396_v1  ;;  %vm46_vm4 = vcmp.eq.s32.totalorder %v26_v15, %v438_v4  ;;  %vm81_vm5 = vcmp.eq.s32.totalorder %v25_v16, %v433_v3  ;;  %vm45_vm6 = vcmp.eq.s32.totalorder %v25_v16, %v438_v4  ;;  %v22_v19 = vadd.s32 16, %v426_v2 }
   0xd   :  { %330 = vmatpush3.msk.msra.mxu0 %vm88_vm7, %v398_v9  ;;  %365 = vmatpush3.msk.msra.mxu1 %vm52_vm8, %v398_v9  ;;  %vm80_vm7 = vcmp.eq.s32.totalorder %v24_v17, %v433_v3  ;;  %vm44_vm8 = vcmp.eq.s32.totalorder %v24_v17, %v438_v4  ;;  %v21_v20 = vadd.s32 8, %v426_v2 }
   0xe   :  { %331 = vmatprep.subr.mxu0 %v396_v1  ;;  %366 = vmatprep.subr.mxu1 %v396_v1 }
   0xf   :  { %332 = vmatpush3.msk.msra.mxu0 %vm87_vm9, %v398_v9  ;;  %367 = vmatpush3.msk.msra.mxu1 %vm51_vm10, %v398_v9  ;;  %vm79_vm9 = vcmp.eq.s32.totalorder %v23_v18, %v433_v3  ;;  %vm43_vm10 = vcmp.eq.s32.totalorder %v23_v18, %v438_v4 }
  0x10   :  { %333 = vmatprep.subr.mxu0 %v396_v1  ;;  %368 = vmatprep.subr.mxu1 %v396_v1 }
  0x11   :  { %334 = vmatpush3.msk.msra.mxu0 %vm86_vm11, %v398_v9  ;;  %369 = vmatpush3.msk.msra.mxu1 %vm50_vm12, %v398_v9  ;;  %vm78_vm11 = vcmp.eq.s32.totalorder %v22_v19, %v433_v3  ;;  %vm42_vm12 = vcmp.eq.s32.totalorder %v22_v19, %v438_v4 }
  0x12   :  { %335 = vmatprep.subr.mxu0 %v396_v1  ;;  %370 = vmatprep.subr.mxu1 %v396_v1 }
  0x13   :  { %336 = vmatpush3.msk.msra.mxu0 %vm85_vm13, %v398_v9  ;;  %371 = vmatpush3.msk.msra.mxu1 %vm49_vm14, %v398_v9  ;;  %vm77_vm13 = vcmp.eq.s32.totalorder %v21_v20, %v433_v3  ;;  %vm41_vm14 = vcmp.eq.s32.totalorder %v21_v20, %v438_v4 }
  0x14   :  { %337 = vmatprep.subr.mxu0 %v396_v1  ;;  %372 = vmatprep.subr.mxu1 %v396_v1 }
  0x15   :  { %338 = vmatpush3.msk.msra.mxu0 %vm84_vm15, %v398_v9  ;;  %373 = vmatpush3.msk.msra.mxu1 %vm48_vm0, %v398_v9  ;;  %vm76_vm15 = vcmp.eq.s32.totalorder %v426_v2, %v433_v3  ;;  %vm40_vm0 = vcmp.eq.s32.totalorder %v426_v2, %v438_v4 }
  0x16   :  { %339 = vmatprep.subr.mxu0 %v396_v1  ;;  %374 = vmatprep.subr.mxu1 %v396_v1 }
  0x17   :  { %340 = vmatpush3.msk.msra.mxu0 %vm83_vm1, %v398_v9  ;;  %375 = vmatpush3.msk.msra.mxu1 %vm47_vm2, %v398_v9 }
  0x18   :  { %341 = vmatprep.subr.mxu0 %v396_v1  ;;  %376 = vmatprep.subr.mxu1 %v396_v1 }
  0x19   :  { %342 = vmatpush3.msk.msra.mxu0 %vm82_vm3, %v398_v9  ;;  %377 = vmatpush3.msk.msra.mxu1 %vm46_vm4, %v398_v9 }
  0x1a   :  { %343 = vmatprep.subr.mxu0 %v396_v1  ;;  %378 = vmatprep.subr.mxu1 %v396_v1 }
  0x1b   :  { %344 = vmatpush3.msk.msra.mxu0 %vm81_vm5, %v398_v9  ;;  %379 = vmatpush3.msk.msra.mxu1 %vm45_vm6, %v398_v9 }
  0x1c   :  { %345 = vmatprep.subr.mxu0 %v396_v1  ;;  %380 = vmatprep.subr.mxu1 %v396_v1 }
  0x1d   :  { %346 = vmatpush3.msk.msra.mxu0 %vm80_vm7, %v398_v9  ;;  %381 = vmatpush3.msk.msra.mxu1 %vm44_vm8, %v398_v9 }
  0x1e   :  { %347 = vmatprep.subr.mxu0 %v396_v1  ;;  %382 = vmatprep.subr.mxu1 %v396_v1 }
  0x1f   :  { %348 = vmatpush3.msk.msra.mxu0 %vm79_vm9, %v398_v9  ;;  %383 = vmatpush3.msk.msra.mxu1 %vm43_vm10, %v398_v9 }
  0x20   :  { %349 = vmatprep.subr.mxu0 %v396_v1  ;;  %384 = vmatprep.subr.mxu1 %v396_v1 }
  0x21   :  { %350 = vmatpush3.msk.msra.mxu0 %vm78_vm11, %v398_v9  ;;  %385 = vmatpush3.msk.msra.mxu1 %vm42_vm12, %v398_v9 }
  0x22   :  { %351 = vmatprep.subr.mxu0 %v396_v1  ;;  %386 = vmatprep.subr.mxu1 %v396_v1 }
  0x23   :  { %352 = vmatpush3.msk.msra.mxu0 %vm77_vm13, %v398_v9  ;;  %387 = vmatpush3.msk.msra.mxu1 %vm41_vm14, %v398_v9 }
  0x24   :  { %353 = vmatprep.subr.mxu0 %v396_v1  ;;  %388 = vmatprep.subr.mxu1 %v396_v1 }
  0x25   :  { %354 = vmatpush3.msk.msra.mxu0 %vm76_vm15, %v398_v9  ;;  %389 = vmatpush3.msk.msra.mxu1 %vm40_vm0, %v398_v9 }
  0x26   :  { %356 = vmatmul.mubr.f32.vlgmr.msra.gmra.mxu0 %v109_v21  ;;  %391 = vmatmul.mubr.f32.vlgmr.msra.gmra.mxu1 %v108_v22 }
  0xe6   :  { %v176_v23 = vpop.f32.mrf.mxu0  ;;  %v246_v24 = vpop.f32.mrf.mxu1 }
  0xe7   :  { %v247_v25 = vadd.f32 %v246_v24, %v176_v23 }
  0xe8   :  { %v357_v26 = vpop.f32.mrf.mxu0  ;;  %v392_v27 = vpop.f32.mrf.mxu1 }
  0xe9   :  { %250 = vst [vmem:[%s564_s4] sm:$0xff] %v247_v25 }

</bundles_post_ra>
